<compile_context>
chip_gen: v7x
topology: tpu7x:2x2x1
jax: 0.10.0
libtpu: 0.0.40
codegen_flags: <defaults>
</compile_context>

<pallas_src>
import functools

import jax
import jax.numpy as jnp
from jax import lax
from jax.experimental import pallas as pl
from jax.experimental.pallas import tpu as pltpu


def _select_matmul_kernel(choice_ref, x_ref, w_ref, o_ref):
    # choice_ref: (1,) int32 scalar-prefetch ref (SMEM). Unused in the body —
    # the weight BlockSpec's index_map already picked the right (K, M) slice,
    # so w_ref is exactly the chosen weight in VMEM.
    del choice_ref
    o_ref[...] = jnp.dot(
        x_ref[...], w_ref[...], preferred_element_type=jnp.float32
    ).astype(o_ref.dtype)


@functools.partial(jax.jit, static_argnames=("m",))
def _forward(choice_idx, x, w_stack, *, m):
    n, k = x.shape
    m_max = w_stack.shape[-1]
    out = pl.pallas_call(
        _select_matmul_kernel,
        out_shape=jax.ShapeDtypeStruct((n, m_max), x.dtype),
        grid_spec=pltpu.PrefetchScalarGridSpec(
            num_scalar_prefetch=1,
            grid=(1,),
            in_specs=[
                # X: whole (N, K) block (equals full dims -> valid tile).
                pl.BlockSpec((n, k), lambda i, c: (0, 0)),
                # Stacked weights (3, K, M_max): only the slice picked by the
                # prefetched choice scalar is DMA'd; kernel sees (K, M_max).
                pl.BlockSpec(
                    (pl.Squeezed(), k, m_max), lambda i, c: (c[0], 0, 0)
                ),
            ],
            out_specs=pl.BlockSpec((n, m_max), lambda i, c: (0, 0)),
        ),
        compiler_params=pltpu.CompilerParams(
            dimension_semantics=("arbitrary",)
        ),
    )(choice_idx, x, w_stack)
    # Drop zero-padded columns (no-op for linear1/2) inside the same compiled
    # executable — no separate host-side slice dispatch.
    return lax.slice(out, (0, 0), (n, m))


class LayerWithParamsDict:
    """JAX/Pallas port of the PyTorch module with an nn.ParameterDict."""

    def __init__(self, key):
        k1, k2, k3 = jax.random.split(key, 3)
        self.params = {
            "linear1": jax.random.normal(k1, (4, 4), dtype=jnp.float32),
            "linear2": jax.random.normal(k2, (4, 4), dtype=jnp.float32),
            "linear3": jax.random.normal(k3, (4, 1), dtype=jnp.float32),
        }
        self._names = ("linear1", "linear2", "linear3")
        # Cache device-resident choice scalars (avoid per-call H2D transfer).
        self._idx = {
            name: jnp.array([i], dtype=jnp.int32)
            for i, name in enumerate(self._names)
        }
        # Stack weights into one (3, K, M_max) array, zero-padding linear3's
        # single column so every choice shares the same block shape.  Only the
        # chosen slice is ever DMA'd into VMEM (index_map selection).
        max_m = max(w.shape[1] for w in self.params.values())
        padded = [
            jnp.pad(
                self.params[n],
                ((0, 0), (0, max_m - self.params[n].shape[1])),
            )
            for n in self._names
        ]
        self._w_stack = jnp.stack(padded, axis=0)  # (3, 4, 4)

    def __call__(self, X, choice="linear1"):
        m = self.params[choice].shape[1]
        return _forward(self._idx[choice], X, self._w_stack, m=m)


if __name__ == "__main__":
    key = jax.random.PRNGKey(0)
    k_x, k_params = jax.random.split(key)

    X = jax.random.normal(k_x, (4, 4), dtype=jnp.float32)
    layer = LayerWithParamsDict(k_params)

    ok = True
    for choice in ("linear1", "linear2", "linear3"):
        out = jax.block_until_ready(layer(X, choice=choice))
        ref = X @ layer.params[choice]
        if out.shape != ref.shape or not jnp.allclose(
            out, ref, atol=1e-5, rtol=1e-5
        ):
            ok = False
            print(
                f"MISMATCH for {choice}: shape {out.shape} vs {ref.shape}, "
                f"max err {float(jnp.max(jnp.abs(out - ref)))}"
            )

    if ok:
        print("KERNEL_OK")
</pallas_src>

<mosaic_0001>
module attributes {stable_mosaic.version = 11 : i64} {
  func.func @_select_matmul_kernel(%arg0: i32, %arg1: memref<1xi32, #tpu.memory_space<smem>>, %arg2: memref<4x4xf32, #tpu.memory_space<vmem>>, %arg3: memref<1x4x4xf32, #tpu.memory_space<vmem>>, %arg4: memref<4x4xf32, #tpu.memory_space<vmem>>) attributes {dimension_semantics = [#tpu.dimension_semantics<arbitrary>], iteration_bounds = array<i64: 1>, scalar_prefetch = 1 : i64, scratch_operands = 0 : i64, tpu.core_type = #tpu.core_type<tc>, window_params = [{pipeline_mode = #tpu.pipeline_mode<synchronous>, transform_indices = @transform_0, window_bounds = array<i64: 4, 4>}, {transform_indices = @transform_1, window_bounds = array<i64: 1, 4, 4>}, {pipeline_mode = #tpu.pipeline_mode<synchronous>, transform_indices = @transform_2, window_bounds = array<i64: 4, 4>}]} {
    %c0 = arith.constant 0 : index
    %c0_0 = arith.constant 0 : index
    %0 = vector.load %arg2[%c0, %c0_0] : memref<4x4xf32, #tpu.memory_space<vmem>>, vector<4x4xf32>
    %c0_1 = arith.constant 0 : index
    %c0_2 = arith.constant 0 : index
    %c0_3 = arith.constant 0 : index
    %1 = vector.load %arg3[%c0_1, %c0_2, %c0_3] : memref<1x4x4xf32, #tpu.memory_space<vmem>>, vector<1x4x4xf32>
    %2 = vector.shape_cast %1 : vector<1x4x4xf32> to vector<4x4xf32>
    %cst = arith.constant dense<0.000000e+00> : vector<4x4xf32>
    %3 = tpu.matmul %0, %2, %cst {dimension_numbers = #tpu.dot_dimension_numbers<[1], [0], [0], [1], [0, 0, 1, 1], [], []>} : vector<4x4xf32>, vector<4x4xf32>, vector<4x4xf32> -> vector<4x4xf32>
    %c0_4 = arith.constant 0 : index
    %c0_5 = arith.constant 0 : index
    %4 = vector.load %arg4[%c0_4, %c0_5] : memref<4x4xf32, #tpu.memory_space<vmem>>, vector<4x4xf32>
    tpu.vector_store %arg4[%c0_4, %c0_5], %3 {strides = array<i32>} : memref<4x4xf32, #tpu.memory_space<vmem>>, vector<4x4xf32>,
    return
  }
  func.func @transform_0(%arg0: i32, %arg1: memref<1xi32, #tpu.memory_space<smem>>) -> (i32, i32) {
    %c0_i32 = arith.constant 0 : i32
    %c0_i32_0 = arith.constant 0 : i32
    %c0_i32_1 = arith.constant 0 : i32
    return %c0_i32, %c0_i32_0 : i32, i32
  }
  func.func @transform_1(%arg0: i32, %arg1: memref<1xi32, #tpu.memory_space<smem>>) -> (i32, i32, i32) {
    %c0 = arith.constant 0 : index
    %0 = memref.load %arg1[%c0] : memref<1xi32, #tpu.memory_space<smem>>
    %c0_i32 = arith.constant 0 : i32
    %c0_i32_0 = arith.constant 0 : i32
    %c0_i32_1 = arith.constant 0 : i32
    return %0, %c0_i32, %c0_i32_0 : i32, i32, i32
  }
  func.func @transform_2(%arg0: i32, %arg1: memref<1xi32, #tpu.memory_space<smem>>) -> (i32, i32) {
    %c0_i32 = arith.constant 0 : i32
    %c0_i32_0 = arith.constant 0 : i32
    %c0_i32_1 = arith.constant 0 : i32
    return %c0_i32, %c0_i32_0 : i32, i32
  }
}

</mosaic_0001>

<bundles_post_ra>
// kernel: _forward.1
= control target key start
LH: loop header
LB: loop body
LE: loop exit
PB: predicated region body
PF: predicated region fallthrough
CT: control target
= control target key end

     0   :  { %9 = vsyncpa [#allocation5], 0  ;;  %s299_s0 = inlined_call_operand.<no memory space> [shape: s32[1], index: 0, kind: input, shape index: {}]   ;;  %s300_s1 = inlined_call_operand.hbm [shape: f32[4,4], index: 1, kind: input, shape index: {}]   ;;  %s301_s2 = inlined_call_operand.hbm [shape: f32[3,4,4], index: 2, kind: input, shape index: {}]   ;;  %s302_s3 = inlined_call_operand.hbm [shape: f32[4,4], index: 3, kind: output, shape index: {}]  }
   0x1   :  { %10 = vsyncpa [#allocation8], 0 }
   0x2   :  { %11 = vsyncpa [#allocation6], 0  ;;  %s142_s14 = sshll.u32 %s299_s0, 6  ;;  %s231_s15 = smov [#allocation4]  }
   0x3   :  { %s18_s16 = sshll.u32 %s231_s15, 4  ;;  %s262_s19 = scalar_lea.hbm %s301_s2, %s142_s14  ;;  %s19_s16 = int_to_ptr.vmem [resolvable:$true] %s18_s16 }
   0x4   :  { %s157_s22 = scalar_lea.hbm %s300_s1, 64 }
   0x5   :  { %p158_p0 = scmp.ne.s32.totalorder %s300_s1, %s157_s22  ;;  %p161_p1 = scmp.lt.u32.totalorder %s157_s22, %s300_s1 }
   0x7   :  { %p163_p2 = pnand %p161_p1, %p158_p0 }
   0x9   :  { %166 = shalt.err (!%p163_p2)
}
   0xa   :  { %s167_s0 = scalar_lea.vmem %s19_s16, 64  ;;  %p172_p4 = scmp.lt.s32.totalorder %s19_s16, %s19_s16 }
   0xb   :  { %p168_p3 = scmp.ne.s32.totalorder %s19_s16, %s167_s0  ;;  %p173_p5 = scmp.lt.s32.totalorder %s167_s0, %s167_s0 }
   0xd   :  { %p174_p6 = por %p173_p5, %p172_p4 }
   0xf   :  { %p175_p7 = pnand %p174_p6, %p168_p3 }
  0x11   :  { %178 = shalt.err (!%p175_p7)
}
  0x12   :  { %21 = dma.hbm_to_vmem [thread:$0]  %s300_s1, 64, %s19_s16, [#allocation5]  }
  0x13   :  { %s232_s29 = smov [#allocation7]   ;;  %s179_s4 = scalar_lea.hbm %s262_s19, 64 }
  0x14   :  { %s31_s30 = sshll.u32 %s232_s29, 4  ;;  %p180_p8 = scmp.ne.s32.totalorder %s262_s19, %s179_s4  ;;  %s32_s30 = int_to_ptr.vmem [resolvable:$true] %s31_s30 }
  0x15   :  { %s181_s7 = scalar_lea.hbm %s301_s2, 192  ;;  %p182_p9 = scmp.lt.u32.totalorder %s262_s19, %s301_s2 }
  0x16   :  { %p183_p10 = scmp.lt.u32.totalorder %s181_s7, %s179_s4  ;;  %p185_p12 = scmp.lt.u32.totalorder %s179_s4, %s262_s19 }
  0x18   :  { %p184_p11 = por %p183_p10, %p182_p9 }
  0x1a   :  { %p186_p13 = por %p185_p12, %p184_p11 }
  0x1c   :  { %p187_p0 = pnand %p186_p13, %p180_p8 }
  0x1e   :  { %190 = shalt.err (!%p187_p0)
}
  0x1f   :  { %s191_s1 = scalar_lea.vmem %s32_s30, 64  ;;  %p196_p2 = scmp.lt.s32.totalorder %s32_s30, %s32_s30 }
  0x20   :  { %p192_p1 = scmp.ne.s32.totalorder %s32_s30, %s191_s1  ;;  %p197_p3 = scmp.lt.s32.totalorder %s191_s1, %s191_s1 }
  0x22   :  { %p198_p4 = por %p197_p3, %p196_p2 }
  0x24   :  { %p199_p5 = pnand %p198_p4, %p192_p1 }
  0x26   :  { %202 = shalt.err (!%p199_p5)
}
  0x27   :  { %34 = dma.hbm_to_vmem [thread:$0]  %s262_s19, 64, %s32_s30, [#allocation8]  }
  0x28   :  { %225 = dma.done.wait [#allocation5], 64  }
  0x29   :  { %226 = vsyncadd [#allocation5], 4294967232 }
  0x2a   :  { %227 = dma.done.wait [#allocation8], 64  }
  0x2b   :  { %228 = vsyncadd [#allocation8], 4294967232  ;;  %v233_v0 = vmov 0.0   ;;  %vm234_vm0 = vmmov 0   ;;  %vm48_vm1 = vcmask 1043456   ;;  %vm44_vm2 = vcmask 31744  }
  0x2c   :  { %147 = vmatprep.subr.mxu0 %v233_v0  ;;  %149 = vmatprep.mubr.msk.f32.mxu0 %vm234_vm0, %v233_v0  ;;  %v43_v1 = vld [vmem:[#allocation7] sm:$0xf]  ;;  %v42_v2 = vld [vmem:[#allocation4] sm:$0xf]  ;;  %s235_s2 = smov [#allocation9]   ;;  %vm122_vm3 = vcmask 27648  }
  0x2d   :  { %148 = vmatpush3.msk.msra.mxu0 %vm48_vm1, %v43_v1  ;;  %s130_s10 = sshll.u32 %s235_s2, 4  ;;  %s131_s10 = int_to_ptr.vmem [resolvable:$true] %s130_s10 }
  0x2e   :  { %150 = vmatmul.mubr.msk.f32.vlgmr.msra.gmra.mrb[0].mxu0 %vm44_vm2, %v42_v2  ;;  %s203_s11 = scalar_lea.vmem %s131_s10, 64  ;;  %p208_p7 = scmp.lt.s32.totalorder %s131_s10, %s131_s10 }
  0x2f   :  { %p204_p6 = scmp.ne.s32.totalorder %s131_s10, %s203_s11  ;;  %p209_p8 = scmp.lt.s32.totalorder %s203_s11, %s203_s11 }
  0x31   :  { %p210_p9 = por %p209_p8, %p208_p7 }
  0x33   :  { %p211_p10 = pnand %p210_p9, %p204_p6 }
 0x101   :  { %v118_v3 = vpop.f32.mrb[0].mxu0 }
 0x102   :  { %v151_v4 = vpop.f32.mrb[1].mxu0  ;;  %123 = vst.msk [vmem:[#allocation9] sm:$0xf] %vm122_vm3, %v118_v3 }
 0x103   :  { %214 = shalt.err (!%p211_p10)
}
 0x104   :  { %s215_s14 = scalar_lea.hbm %s302_s3, 64 }
 0x105   :  { %p216_p11 = scmp.ne.s32.totalorder %s302_s3, %s215_s14  ;;  %p219_p12 = scmp.lt.u32.totalorder %s215_s14, %s302_s3 }
 0x107   :  { %p221_p13 = pnand %p219_p12, %p216_p11 }
 0x109   :  { %224 = shalt.err (!%p221_p13)
}
 0x10a   :  { %133 = dma.vmem_to_hbm [thread:$0]  %s131_s10, 64, %s302_s3, [#allocation6]  }
 0x10b   :  { %229 = dma.done.wait [#allocation6], 64  }
 0x10c   :  { %230 = vsyncadd [#allocation6], 4294967232 }
 0x10d   :  { %137 = vsyncpa [#allocation5], 1 }
 0x10e   :  { %138 = vsyncpa [#allocation8], 1 }
 0x10f   :  { %139 = vsyncpa [#allocation6], 1 }

</bundles_post_ra>
